<compile_context>
chip_gen: v7x
topology: tpu7x:2x2x1
jax: 0.10.0
libtpu: 0.0.40
codegen_flags: <defaults>
</compile_context>

<pallas_src>
import jax
import jax.numpy as jnp
import numpy as np
from jax.experimental import pallas as pl
from jax.experimental.pallas import tpu as pltpu

F_IN, HID, F_OUT = 10, 20, 1      # logical PyTorch dims
PACK = 8                          # batch elements packed per sublane-row
HC = 32                           # per-element hidden width padded 20 -> 32
XW = PACK * F_IN                  # 80   packed input width  (lane axis)
HW = PACK * HC                    # 256  packed hidden width (lane axis, 2 lane-tiles)
OW = PACK * F_OUT                 # 8    packed output width


def adversary_kernel(x_ref, w1_ref, b1_ref, w2_ref, b2_ref, w3_ref, b3_ref, o_ref):
    # x_ref: (TR, 80) f32 — 8 batch elements per row, native batch-major HBM order.
    x = x_ref[...].astype(jnp.bfloat16)                                        # bf16 into MXU
    h = jnp.dot(x, w1_ref[...], preferred_element_type=jnp.float32) + b1_ref[...]
    h = jnp.maximum(h, 0.0)                                                    # (TR, 256) f32
    h = jnp.dot(h.astype(jnp.bfloat16), w2_ref[...],
                preferred_element_type=jnp.float32) + b2_ref[...]
    h = jnp.maximum(h, 0.0)                                                    # (TR, 256) f32
    z = jnp.dot(h.astype(jnp.bfloat16), w3_ref[...],
                preferred_element_type=jnp.float32) + b3_ref[...]              # (TR, 8) f32
    # Exact sigmoid: kernel is HBM/step-overhead bound, so the EUP exp + f32 divide is free.
    o_ref[...] = (1.0 / (1.0 + jnp.exp(-z))).astype(o_ref.dtype)


def _round_up(n, m):
    return ((n + m - 1) // m) * m


def expand_params(params):
    """PyTorch-layout params -> 8-way block-diagonal packed weights (bf16) + biases (f32)."""
    w1, b1, w2, b2, w3, b3 = params
    w1p = jnp.zeros((F_IN, HC), jnp.float32).at[:, :HID].set(jnp.asarray(w1, jnp.float32).T)
    w2p = jnp.zeros((HC, HC), jnp.float32).at[:HID, :HID].set(jnp.asarray(w2, jnp.float32).T)
    w3p = jnp.zeros((HC, F_OUT), jnp.float32).at[:HID, :].set(jnp.asarray(w3, jnp.float32).T)
    b1p = jnp.zeros((HC,), jnp.float32).at[:HID].set(jnp.asarray(b1, jnp.float32))
    b2p = jnp.zeros((HC,), jnp.float32).at[:HID].set(jnp.asarray(b2, jnp.float32))
    eye = jnp.eye(PACK, dtype=jnp.float32)
    w1e = jnp.kron(eye, w1p).astype(jnp.bfloat16)             # (80, 256)
    w2e = jnp.kron(eye, w2p).astype(jnp.bfloat16)             # (256, 256)
    w3e = jnp.kron(eye, w3p).astype(jnp.bfloat16)             # (256, 8)
    b1e = jnp.tile(b1p, PACK).reshape(1, HW)                  # (1, 256) f32
    b2e = jnp.tile(b2p, PACK).reshape(1, HW)                  # (1, 256) f32
    b3e = jnp.tile(jnp.asarray(b3, jnp.float32), PACK).reshape(1, OW)   # (1, 8) f32
    return w1e, b1e, w2e, b2e, w3e, b3e


def adversary_forward(x, params, *, block_b=16384):
    """x: (B, 10). Returns (B, 1) float32 sigmoid probabilities (PyTorch semantics)."""
    B = x.shape[0]
    Bp = _round_up(B, PACK)
    x = x.astype(jnp.float32)
    if Bp != B:
        # Rare ragged case only: pad to a multiple of 8 rows (sliced off again below).
        x = jnp.pad(x, ((0, Bp - B), (0, 0)))
    R = Bp // PACK
    # Free row-major view: (Bp, 10) and (R, 80) share the same HBM buffer -> no extra pass.
    x2 = x.reshape(R, XW)

    # Packed rows per grid step. Large by default (16384 batch elems -> 2048 rows) to
    # amortize the ~0.35 us/step overhead; clamp for small batches; keep a multiple of 8.
    # (On v7x prefer a block_b giving an even number of grid steps so both TCs get work.)
    TR = min(max(block_b // PACK, 8), _round_up(R, 8))
    TR = max(8, (TR // 8) * 8)
    grid = (pl.cdiv(R, TR),)

    w1e, b1e, w2e, b2e, w3e, b3e = expand_params(params)
    # Constant block index -> weights/biases stay resident in VMEM across all grid steps.
    resident = lambda a: pl.BlockSpec(a.shape, lambda i: (0, 0))

    flops = 2 * R * (XW * HW + HW * HW + HW * OW)
    bytes_accessed = (x2.size * x2.dtype.itemsize + R * OW * 4
                      + 2 * (w1e.size + w2e.size + w3e.size)
                      + 4 * (b1e.size + b2e.size + b3e.size))
    cost = pl.CostEstimate(flops=flops, transcendentals=R * OW,
                           bytes_accessed=bytes_accessed)

    out2 = pl.pallas_call(
        adversary_kernel,
        out_shape=jax.ShapeDtypeStruct((R, OW), jnp.float32),
        grid=grid,
        in_specs=[
            pl.BlockSpec((TR, XW), lambda i: (i, 0)),    # streamed input tile (auto double-buffered)
            resident(w1e), resident(b1e),
            resident(w2e), resident(b2e),
            resident(w3e), resident(b3e),
        ],
        out_specs=pl.BlockSpec((TR, OW), lambda i: (i, 0)),   # lane-dense output slab
        compiler_params=pltpu.CompilerParams(
            dimension_semantics=("parallel",),           # 2-TC sharding on v7x
            vmem_limit_bytes=48 * 1024 * 1024),          # headroom for big tiles on v5e's 16MiB default
        cost_estimate=cost,
    )(x2, w1e, b1e, w2e, b2e, w3e, b3e)

    # (R, 8) row-major is exactly the (Bp, 1) result -> free reshape + tiny tail slice.
    return out2.reshape(Bp, 1)[:B]


def init_params(key):
    """PyTorch-default-like init: weight (out,in), bias (out,), U[-1/sqrt(fan_in), +]."""
    def linear(k, fan_in, fan_out):
        kw, kb = jax.random.split(k)
        bound = 1.0 / np.sqrt(fan_in)
        w = jax.random.uniform(kw, (fan_out, fan_in), jnp.float32, -bound, bound)
        b = jax.random.uniform(kb, (fan_out,), jnp.float32, -bound, bound)
        return w, b

    k1, k2, k3 = jax.random.split(key, 3)
    w1, b1 = linear(k1, F_IN, HID)
    w2, b2 = linear(k2, HID, HID)
    w3, b3 = linear(k3, HID, F_OUT)
    return (w1, b1, w2, b2, w3, b3)


def reference_forward(x, params):
    w1, b1, w2, b2, w3, b3 = params
    h = jnp.maximum(x @ w1.T + b1, 0.0)
    h = jnp.maximum(h @ w2.T + b2, 0.0)
    return jax.nn.sigmoid(h @ w3.T + b3)


if __name__ == "__main__":
    key = jax.random.PRNGKey(0)
    k_x1, k_x2, k_p = jax.random.split(key, 3)
    params = init_params(k_p)

    # Small batch: single grid step, tile clamped.
    x_small = jax.random.normal(k_x1, (16, F_IN), jnp.float32)
    out_small = jax.block_until_ready(adversary_forward(x_small, params))

    # Ragged batch (300 % 8 != 0) with a small tile: multi-step pipeline + masked tail block.
    x_big = jax.random.normal(k_x2, (300, F_IN), jnp.float32)
    out_big = jax.block_until_ready(adversary_forward(x_big, params, block_b=128))

    for xin, out in ((x_small, out_small), (x_big, out_big)):
        ref = reference_forward(xin, params)
        # bf16 MXU inputs (f32 accumulation, exact sigmoid) -> small absolute slack.
        np.testing.assert_allclose(np.asarray(out), np.asarray(ref), rtol=0.0, atol=2e-2)

    print("KERNEL_OK")
</pallas_src>

<mosaic_0001>
module attributes {stable_mosaic.version = 11 : i64} {
  func.func @adversary_kernel(%arg0: i32, %arg1: memref<8x80xf32, #tpu.memory_space<vmem>>, %arg2: memref<80x256xbf16, #tpu.memory_space<vmem>>, %arg3: memref<1x256xf32, #tpu.memory_space<vmem>>, %arg4: memref<256x256xbf16, #tpu.memory_space<vmem>>, %arg5: memref<1x256xf32, #tpu.memory_space<vmem>>, %arg6: memref<256x8xbf16, #tpu.memory_space<vmem>>, %arg7: memref<1x8xf32, #tpu.memory_space<vmem>>, %arg8: memref<8x8xf32, #tpu.memory_space<vmem>>) attributes {dimension_semantics = [#tpu.dimension_semantics<parallel>], iteration_bounds = array<i64: 1>, scalar_prefetch = 0 : i64, scratch_operands = 0 : i64, tpu.core_type = #tpu.core_type<tc>, window_params = [{transform_indices = @transform_0, window_bounds = array<i64: 8, 80>}, {pipeline_mode = #tpu.pipeline_mode<synchronous>, transform_indices = @transform_1, window_bounds = array<i64: 80, 256>}, {pipeline_mode = #tpu.pipeline_mode<synchronous>, transform_indices = @transform_2, window_bounds = array<i64: 1, 256>}, {pipeline_mode = #tpu.pipeline_mode<synchronous>, transform_indices = @transform_3, window_bounds = array<i64: 256, 256>}, {pipeline_mode = #tpu.pipeline_mode<synchronous>, transform_indices = @transform_4, window_bounds = array<i64: 1, 256>}, {pipeline_mode = #tpu.pipeline_mode<synchronous>, transform_indices = @transform_5, window_bounds = array<i64: 256, 8>}, {pipeline_mode = #tpu.pipeline_mode<synchronous>, transform_indices = @transform_6, window_bounds = array<i64: 1, 8>}, {transform_indices = @transform_7, window_bounds = array<i64: 8, 8>}]} {
    %c0 = arith.constant 0 : index
    %c0_0 = arith.constant 0 : index
    %0 = vector.load %arg1[%c0, %c0_0] : memref<8x80xf32, #tpu.memory_space<vmem>>, vector<8x80xf32>
    %1 = arith.truncf %0 : vector<8x80xf32> to vector<8x80xbf16>
    %c0_1 = arith.constant 0 : index
    %c0_2 = arith.constant 0 : index
    %2 = vector.load %arg2[%c0_1, %c0_2] : memref<80x256xbf16, #tpu.memory_space<vmem>>, vector<80x256xbf16>
    %cst = arith.constant dense<0.000000e+00> : vector<8x256xf32>
    %3 = tpu.matmul %1, %2, %cst {dimension_numbers = #tpu.dot_dimension_numbers<[1], [0], [0], [1], [0, 0, 1, 1], [], []>} : vector<8x80xbf16>, vector<80x256xbf16>, vector<8x256xf32> -> vector<8x256xf32>
    %c0_3 = arith.constant 0 : index
    %c0_4 = arith.constant 0 : index
    %4 = vector.load %arg3[%c0_3, %c0_4] : memref<1x256xf32, #tpu.memory_space<vmem>>, vector<1x256xf32>
    %5 = vector.broadcast %4 : vector<1x256xf32> to vector<8x256xf32>
    %6 = arith.addf %3, %5 : vector<8x256xf32>
    %cst_5 = arith.constant 0.000000e+00 : f32
    %7 = vector.broadcast %cst_5 : f32 to vector<8x256xf32>
    %8 = arith.maximumf %6, %7 : vector<8x256xf32>
    %9 = arith.truncf %8 : vector<8x256xf32> to vector<8x256xbf16>
    %c0_6 = arith.constant 0 : index
    %c0_7 = arith.constant 0 : index
    %10 = vector.load %arg4[%c0_6, %c0_7] : memref<256x256xbf16, #tpu.memory_space<vmem>>, vector<256x256xbf16>
    %cst_8 = arith.constant dense<0.000000e+00> : vector<8x256xf32>
    %11 = tpu.matmul %9, %10, %cst_8 {dimension_numbers = #tpu.dot_dimension_numbers<[1], [0], [0], [1], [0, 0, 1, 1], [], []>} : vector<8x256xbf16>, vector<256x256xbf16>, vector<8x256xf32> -> vector<8x256xf32>
    %c0_9 = arith.constant 0 : index
    %c0_10 = arith.constant 0 : index
    %12 = vector.load %arg5[%c0_9, %c0_10] : memref<1x256xf32, #tpu.memory_space<vmem>>, vector<1x256xf32>
    %13 = vector.broadcast %12 : vector<1x256xf32> to vector<8x256xf32>
    %14 = arith.addf %11, %13 : vector<8x256xf32>
    %cst_11 = arith.constant 0.000000e+00 : f32
    %15 = vector.broadcast %cst_11 : f32 to vector<8x256xf32>
    %16 = arith.maximumf %14, %15 : vector<8x256xf32>
    %17 = arith.truncf %16 : vector<8x256xf32> to vector<8x256xbf16>
    %c0_12 = arith.constant 0 : index
    %c0_13 = arith.constant 0 : index
    %18 = vector.load %arg6[%c0_12, %c0_13] : memref<256x8xbf16, #tpu.memory_space<vmem>>, vector<256x8xbf16>
    %cst_14 = arith.constant dense<0.000000e+00> : vector<8x8xf32>
    %19 = tpu.matmul %17, %18, %cst_14 {dimension_numbers = #tpu.dot_dimension_numbers<[1], [0], [0], [1], [0, 0, 1, 1], [], []>} : vector<8x256xbf16>, vector<256x8xbf16>, vector<8x8xf32> -> vector<8x8xf32>
    %c0_15 = arith.constant 0 : index
    %c0_16 = arith.constant 0 : index
    %20 = vector.load %arg7[%c0_15, %c0_16] : memref<1x8xf32, #tpu.memory_space<vmem>>, vector<1x8xf32>
    %21 = vector.broadcast %20 : vector<1x8xf32> to vector<8x8xf32>
    %22 = arith.addf %19, %21 : vector<8x8xf32>
    %cst_17 = arith.constant 0.000000e+00 : f32
    %23 = vector.broadcast %cst_17 : f32 to vector<8x8xf32>
    %24 = arith.subf %23, %22 : vector<8x8xf32>
    %25 = math.exp %24 : vector<8x8xf32>
    %cst_18 = arith.constant 1.000000e+00 : f32
    %26 = vector.broadcast %cst_18 : f32 to vector<8x8xf32>
    %27 = arith.addf %26, %25 : vector<8x8xf32>
    %cst_19 = arith.constant 1.000000e+00 : f32
    %28 = vector.broadcast %cst_19 : f32 to vector<8x8xf32>
    %29 = arith.divf %28, %27 : vector<8x8xf32>
    %c0_20 = arith.constant 0 : index
    %c0_21 = arith.constant 0 : index
    %30 = vector.load %arg8[%c0_20, %c0_21] : memref<8x8xf32, #tpu.memory_space<vmem>>, vector<8x8xf32>
    tpu.vector_store %arg8[%c0_20, %c0_21], %29 {strides = array<i32>} : memref<8x8xf32, #tpu.memory_space<vmem>>, vector<8x8xf32>,
    return
  }
  func.func @transform_0(%arg0: i32) -> (i32, i32) {
    %c0_i32 = arith.constant 0 : i32
    %c0_i32_0 = arith.constant 0 : i32
    return %arg0, %c0_i32 : i32, i32
  }
  func.func @transform_1(%arg0: i32) -> (i32, i32) {
    %c0_i32 = arith.constant 0 : i32
    %c0_i32_0 = arith.constant 0 : i32
    %c0_i32_1 = arith.constant 0 : i32
    return %c0_i32, %c0_i32_0 : i32, i32
  }
  func.func @transform_2(%arg0: i32) -> (i32, i32) {
    %c0_i32 = arith.constant 0 : i32
    %c0_i32_0 = arith.constant 0 : i32
    %c0_i32_1 = arith.constant 0 : i32
    return %c0_i32, %c0_i32_0 : i32, i32
  }
  func.func @transform_3(%arg0: i32) -> (i32, i32) {
    %c0_i32 = arith.constant 0 : i32
    %c0_i32_0 = arith.constant 0 : i32
    %c0_i32_1 = arith.constant 0 : i32
    return %c0_i32, %c0_i32_0 : i32, i32
  }
  func.func @transform_4(%arg0: i32) -> (i32, i32) {
    %c0_i32 = arith.constant 0 : i32
    %c0_i32_0 = arith.constant 0 : i32
    %c0_i32_1 = arith.constant 0 : i32
    return %c0_i32, %c0_i32_0 : i32, i32
  }
  func.func @transform_5(%arg0: i32) -> (i32, i32) {
    %c0_i32 = arith.constant 0 : i32
    %c0_i32_0 = arith.constant 0 : i32
    %c0_i32_1 = arith.constant 0 : i32
    return %c0_i32, %c0_i32_0 : i32, i32
  }
  func.func @transform_6(%arg0: i32) -> (i32, i32) {
    %c0_i32 = arith.constant 0 : i32
    %c0_i32_0 = arith.constant 0 : i32
    %c0_i32_1 = arith.constant 0 : i32
    return %c0_i32, %c0_i32_0 : i32, i32
  }
  func.func @transform_7(%arg0: i32) -> (i32, i32) {
    %c0_i32 = arith.constant 0 : i32
    %c0_i32_0 = arith.constant 0 : i32
    return %arg0, %c0_i32 : i32, i32
  }
}

</mosaic_0001>

<bundles_post_ra>
// kernel: tpu_custom_call.1
= control target key start
LH: loop header
LB: loop body
LE: loop exit
PB: predicated region body
PF: predicated region fallthrough
CT: control target
= control target key end

     0   :  { %12 = vsyncpa [#allocation3], 0  ;;  %s995_s0 = inlined_call_operand.vmem [shape: f32[2,80], index: 0, kind: input, shape index: {}]   ;;  %s996_s1 = inlined_call_operand.vmem [shape: bf16[80,256], index: 1, kind: input, shape index: {}]   ;;  %s997_s2 = inlined_call_operand.vmem [shape: f32[1,256], index: 2, kind: input, shape index: {}]   ;;  %s998_s3 = inlined_call_operand.hbm [shape: bf16[256,256], index: 3, kind: input, shape index: {}]   ;;  %s999_s4 = inlined_call_operand.vmem [shape: f32[1,256], index: 4, kind: input, shape index: {}]   ;;  %s1000_s5 = inlined_call_operand.vmem [shape: bf16[256,8], index: 5, kind: input, shape index: {}]   ;;  %s1001_s6 = inlined_call_operand.vmem [shape: f32[1,8], index: 6, kind: input, shape index: {}]   ;;  %s1002_s7 = inlined_call_operand.hbm [shape: f32[2,8], index: 7, kind: output, shape index: {}]  }
   0x1   :  { %13 = vsyncpa [#allocation4], 0  ;;  %s834_s24 = smov [#allocation2]   ;;  %s786_s28 = scalar_lea.hbm %s998_s3, 4096 }
   0x2   :  { %s25_s25 = sshll.u32 %s834_s24, 4  ;;  %p787_p0 = scmp.ne.s32.totalorder %s998_s3, %s786_s28  ;;  %s26_s25 = int_to_ptr.vmem [resolvable:$true] %s25_s25 }
   0x3   :  { %p790_p1 = scmp.lt.u32.totalorder %s786_s28, %s998_s3 }
   0x5   :  { %p792_p2 = pnand %p790_p1, %p787_p0 }
   0x7   :  { %795 = shalt.err (!%p792_p2)
}
   0x8   :  { %s796_s10 = scalar_lea.vmem %s26_s25, 4096  ;;  %p801_p4 = scmp.lt.s32.totalorder %s26_s25, %s26_s25 }
   0x9   :  { %p797_p3 = scmp.ne.s32.totalorder %s26_s25, %s796_s10  ;;  %p802_p5 = scmp.lt.s32.totalorder %s796_s10, %s796_s10 }
   0xb   :  { %p803_p6 = por %p802_p5, %p801_p4 }
   0xd   :  { %p804_p7 = pnand %p803_p6, %p797_p3 }
   0xf   :  { %807 = shalt.err (!%p804_p7)
}
  0x10   :  { %s835_s11 = smov 128   ;;  %s836_s12 = smov 8  }
  0x11   :  { %31 = dma.hbm_to_vmem [thread:$0]  %s998_s3, 4096, %s26_s25, [#allocation3], %s835_s11, %s835_s11, %s836_s12  }
  0x12   :  { %830 = dma.done.wait [#allocation3], 4096  }
  0x13   :  { %831 = vsyncadd [#allocation3], 4294963200  ;;  %v837_v0 = vmov 0   ;;  %v703_v1 = vld [vmem:[%s996_s1 + $0x4] ss:$8 sps:$4 sm:$0xff]   ;;  %vm116_vm0 = vcmask 654336   ;;  %v56_v57 = vlaneseq }
  0x14   :  { %152 = vmatprep.mubr.bf16.mxu0 %v837_v0  ;;  %v705_v2 = vld [vmem:[%s996_s1] ss:$8 sps:$4 sm:$0xff]   ;;  %120 = vmatprep.subr.bf16.mxu0 %v703_v1  ;;  %v706_v3 = vld [vmem:[%s996_s1 + $0x14] ss:$8 sps:$4 sm:$0xff]   ;;  %v708_v4 = vld [vmem:[%s996_s1 + $0x10] ss:$8 sps:$4 sm:$0xff]  }
  0x15   :  { %121 = vmatpush1.bf16.msra.mxu0 %v705_v2  ;;  %v709_v5 = vld [vmem:[%s996_s1 + $0x24] ss:$8 sps:$4 sm:$0xff]   ;;  %v711_v6 = vld [vmem:[%s996_s1 + $0x20] ss:$8 sps:$4 sm:$0xff]   ;;  %v712_v7 = vld [vmem:[%s996_s1 + $0x34] ss:$8 sps:$4 sm:$0xff]  }
  0x16   :  { %122 = vmatprep.subr.bf16.mxu0 %v706_v3  ;;  %v718_v8 = vld [vmem:[#allocation2 + $0x4] ss:$8 sps:$4 sm:$0xff]   ;;  %v720_v9 = vld [vmem:[#allocation2] ss:$8 sps:$4 sm:$0xff]   ;;  %v721_v10 = vld [vmem:[#allocation2 + $0x14] ss:$8 sps:$4 sm:$0xff]  }
  0x17   :  { %369 = vmatprep.subr.bf16.mxu1 %v718_v8  ;;  %v714_v11 = vld [vmem:[%s996_s1 + $0x30] ss:$8 sps:$4 sm:$0xff]   ;;  %v724_v13 = vld [vmem:[#allocation2 + $0x24] ss:$8 sps:$4 sm:$0xff]   ;;  %v717_v15 = vld [vmem:[%s996_s1 + $0x40] ss:$8 sps:$4 sm:$0xff]  }
  0x18   :  { %370 = vmatpush1.bf16.msra.mxu1 %v720_v9  ;;  %v723_v12 = vld [vmem:[#allocation2 + $0x10] ss:$8 sps:$4 sm:$0xff]   ;;  %v715_v14 = vld [vmem:[%s996_s1 + $0x44] ss:$8 sps:$4 sm:$0xff]   ;;  %v726_v17 = vld [vmem:[#allocation2 + $0x20] ss:$8 sps:$4 sm:$0xff]  }
  0x19   :  { %123 = vmatpush1.bf16.msra.mxu0 %v708_v4  ;;  %371 = vmatprep.subr.bf16.mxu1 %v721_v10  ;;  %v42_v16 = vld [vmem:[%s995_s0] sm:$0xff]  ;;  %v727_v18 = vld [vmem:[#allocation2 + $0x34] ss:$8 sps:$4 sm:$0xff]   ;;  %v729_v20 = vld [vmem:[#allocation2 + $0x30] ss:$8 sps:$4 sm:$0xff]   ;;  %v57_v58 = vshrl.u32 %v56_v57, 7 }
  0x1a   :  { %124 = vmatprep.subr.bf16.mxu0 %v709_v5  ;;  %v43_v19 = vpack.c.bf16 %v42_v16, %v42_v16  ;;  %v730_v21 = vld [vmem:[#allocation2 + $0x44] ss:$8 sps:$4 sm:$0xff]   ;;  %v732_v22 = vld [vmem:[#allocation2 + $0x40] ss:$8 sps:$4 sm:$0xff]   ;;  %v733_v23 = vld [vmem:[#allocation2 + $0x54] ss:$8 sps:$4 sm:$0xff]  }
  0x1b   :  { %v735_v24 = vld [vmem:[#allocation2 + $0x50] ss:$8 sps:$4 sm:$0xff]   ;;  %v736_v25 = vld [vmem:[#allocation2 + $0x64] ss:$8 sps:$4 sm:$0xff]   ;;  %v738_v26 = vld [vmem:[#allocation2 + $0x60] ss:$8 sps:$4 sm:$0xff]  }
  0x1c   :  { %372 = vmatpush1.bf16.msra.mxu1 %v723_v12  ;;  %v739_v27 = vld [vmem:[#allocation2 + $0x74] ss:$8 sps:$4 sm:$0xff]   ;;  %v741_v28 = vld [vmem:[#allocation2 + $0x70] ss:$8 sps:$4 sm:$0xff]   ;;  %v742_v29 = vld [vmem:[#allocation2 + $0x84] ss:$8 sps:$4 sm:$0xff]  }
  0x1d   :  { %125 = vmatpush1.bf16.msra.mxu0 %v711_v6  ;;  %373 = vmatprep.subr.bf16.mxu1 %v724_v13  ;;  %v744_v30 = vld [vmem:[#allocation2 + $0x80] ss:$8 sps:$4 sm:$0xff]   ;;  %v745_v31 = vld [vmem:[#allocation2 + $0x94] ss:$8 sps:$4 sm:$0xff]   ;;  %v747_v32 = vld [vmem:[#allocation2 + $0x90] ss:$8 sps:$4 sm:$0xff]  }
  0x1e   :  { %126 = vmatprep.subr.bf16.mxu0 %v712_v7  ;;  %v748_v33 = vld [vmem:[#allocation2 + $0xa4] ss:$8 sps:$4 sm:$0xff]   ;;  %v750_v34 = vld [vmem:[#allocation2 + $0xa0] ss:$8 sps:$4 sm:$0xff]   ;;  %v751_v35 = vld [vmem:[#allocation2 + $0xb4] ss:$8 sps:$4 sm:$0xff]  }
  0x1f   :  { %v753_v36 = vld [vmem:[#allocation2 + $0xb0] ss:$8 sps:$4 sm:$0xff]   ;;  %v754_v37 = vld [vmem:[#allocation2 + $0xc4] ss:$8 sps:$4 sm:$0xff]   ;;  %v756_v38 = vld [vmem:[#allocation2 + $0xc0] ss:$8 sps:$4 sm:$0xff]  }
  0x20   :  { %374 = vmatpush1.bf16.msra.mxu1 %v726_v17  ;;  %v757_v39 = vld [vmem:[#allocation2 + $0xd4] ss:$8 sps:$4 sm:$0xff]   ;;  %v759_v40 = vld [vmem:[#allocation2 + $0xd0] ss:$8 sps:$4 sm:$0xff]   ;;  %v760_v41 = vld [vmem:[#allocation2 + $0xe4] ss:$8 sps:$4 sm:$0xff]  }
  0x21   :  { %127 = vmatpush1.bf16.msra.mxu0 %v714_v11  ;;  %375 = vmatprep.subr.bf16.mxu1 %v727_v18  ;;  %v762_v42 = vld [vmem:[#allocation2 + $0xe0] ss:$8 sps:$4 sm:$0xff]   ;;  %v763_v43 = vld [vmem:[#allocation2 + $0xf4] ss:$8 sps:$4 sm:$0xff]   ;;  %v765_v44 = vld [vmem:[#allocation2 + $0xf0] ss:$8 sps:$4 sm:$0xff]  }
  0x22   :  { %128 = vmatprep.subr.bf16.mxu0 %v715_v14  ;;  %v766_v45 = vld [vmem:[%s1000_s5 + $0x40] sm:$0xff]   ;;  %v768_v47 = vld [vmem:[%s1000_s5 + $0x48] sm:$0xff]   ;;  %v770_v49 = vld [vmem:[%s1000_s5 + $0x50] sm:$0xff]   ;;  %v58_v59 = vsub.s32 0, %v57_v58  ;;  %v62_v61 = vsub.s32 1, %v57_v58  ;;  %vm595_vm1 = vcmask 64512  }
  0x23   :  { %v767_v46 = vld [vmem:[%s1000_s5] sm:$0xff]   ;;  %v769_v48 = vld [vmem:[%s1000_s5 + $0x8] sm:$0xff]   ;;  %v771_v50 = vld [vmem:[%s1000_s5 + $0x10] sm:$0xff]  }
  0x24   :  { %376 = vmatpush1.bf16.msra.mxu1 %v729_v20  ;;  %v772_v51 = vld [vmem:[%s1000_s5 + $0x58] sm:$0xff]   ;;  %v774_v53 = vld [vmem:[%s1000_s5 + $0x60] sm:$0xff]   ;;  %v776_v55 = vld [vmem:[%s1000_s5 + $0x68] sm:$0xff]  }
  0x25   :  { %129 = vmatpush1.bf16.msra.mxu0 %v717_v15  ;;  %377 = vmatprep.subr.bf16.mxu1 %v730_v21  ;;  %v773_v52 = vld [vmem:[%s1000_s5 + $0x18] sm:$0xff]   ;;  %v775_v54 = vld [vmem:[%s1000_s5 + $0x20] sm:$0xff]   ;;  %v777_v56 = vld [vmem:[%s1000_s5 + $0x28] sm:$0xff]  }
  0x26   :  { %674 = vmatprep.subr.bf16.mxu0 %v766_v45  ;;  %v54_v60 = vld [vmem:[%s997_s2] sm:$0x3]  ;;  %v778_v10 = vld [vmem:[%s1000_s5 + $0x70] sm:$0xff]   ;;  %v780_v12 = vld [vmem:[%s1000_s5 + $0x78] sm:$0xff]  }
  0x27   :  { %v59_v62 = vrot.slane %v54_v60, %v58_v59  ;;  %v63_v63 = vrot.slane %v54_v60, %v62_v61  ;;  %v779_v11 = vld [vmem:[%s1000_s5 + $0x30] sm:$0xff]   ;;  %v781_v13 = vld [vmem:[%s1000_s5 + $0x38] sm:$0xff]   ;;  %v197_v14 = vld [vmem:[%s999_s4] sm:$0x3] }
  0x28   :  { %624 = vmatmul.mubr.msk.bf16.vlgmr.msra.gmra.mrb[0].mxu0 %vm116_vm0, %v43_v19  ;;  %378 = vmatpush1.bf16.msra.mxu1 %v732_v22  ;;  %v202_v15 = vrot.slane %v197_v14, %v58_v59  ;;  %v206_v16 = vrot.slane %v197_v14, %v62_v61 }
  0x29   :  { %379 = vmatprep.subr.bf16.mxu1 %v733_v23  ;;  %675 = vmatpush3.bf16.msra.mxu0 %v767_v46 }
  0x2a   :  { %676 = vmatprep.subr.bf16.mxu0 %v768_v47 }
  0x2c   :  { %380 = vmatpush1.bf16.msra.mxu1 %v735_v24 }
  0x2d   :  { %381 = vmatprep.subr.bf16.mxu1 %v736_v25  ;;  %677 = vmatpush3.bf16.msra.mxu0 %v769_v48 }
  0x2e   :  { %678 = vmatprep.subr.bf16.mxu0 %v770_v49 }
  0x30   :  { %382 = vmatpush1.bf16.msra.mxu1 %v738_v26 }
  0x31   :  { %383 = vmatprep.subr.bf16.mxu1 %v739_v27  ;;  %679 = vmatpush3.bf16.msra.mxu0 %v771_v50 }
  0x32   :  { %680 = vmatprep.subr.bf16.mxu0 %v772_v51 }
  0x34   :  { %384 = vmatpush1.bf16.msra.mxu1 %v741_v28  ;;  %v657_v28 = vld [vmem:[%s1001_s6] ss:$0 sm:$0xff] }
  0x35   :  { %385 = vmatprep.subr.bf16.mxu1 %v742_v29  ;;  %681 = vmatpush3.bf16.msra.mxu0 %v773_v52 }
  0x36   :  { %682 = vmatprep.subr.bf16.mxu0 %v774_v53 }
  0x38   :  { %386 = vmatpush1.bf16.msra.mxu1 %v744_v30 }
  0x39   :  { %387 = vmatprep.subr.bf16.mxu1 %v745_v31  ;;  %683 = vmatpush3.bf16.msra.mxu0 %v775_v54 }
  0x3a   :  { %684 = vmatprep.subr.bf16.mxu0 %v776_v55 }
  0x3c   :  { %388 = vmatpush1.bf16.msra.mxu1 %v747_v32 }
  0x3d   :  { %389 = vmatprep.subr.bf16.mxu1 %v748_v33  ;;  %685 = vmatpush3.bf16.msra.mxu0 %v777_v56 }
  0x3e   :  { %686 = vmatprep.subr.bf16.mxu0 %v778_v10 }
  0x40   :  { %390 = vmatpush1.bf16.msra.mxu1 %v750_v34 }
  0x41   :  { %391 = vmatprep.subr.bf16.mxu1 %v751_v35  ;;  %687 = vmatpush3.bf16.msra.mxu0 %v779_v11 }
  0x42   :  { %688 = vmatprep.subr.bf16.mxu0 %v780_v12 }
  0x44   :  { %392 = vmatpush1.bf16.msra.mxu1 %v753_v36 }
  0x45   :  { %393 = vmatprep.subr.bf16.mxu1 %v754_v37  ;;  %689 = vmatpush3.bf16.msra.mxu0 %v781_v13 }
  0x48   :  { %394 = vmatpush1.bf16.msra.mxu1 %v756_v38 }
  0x49   :  { %395 = vmatprep.subr.bf16.mxu1 %v757_v39 }
  0x4c   :  { %396 = vmatpush1.bf16.msra.mxu1 %v759_v40 }
  0x4d   :  { %397 = vmatprep.subr.bf16.mxu1 %v760_v41 }
  0x50   :  { %398 = vmatpush1.bf16.msra.mxu1 %v762_v42 }
  0x51   :  { %399 = vmatprep.subr.bf16.mxu1 %v763_v43 }
  0x54   :  { %400 = vmatpush1.bf16.msra.mxu1 %v765_v44 }
  0xfb   :  { %v154_v0 = vpop.f32.mrb[0].mxu0 }
  0xfc   :  { %v155_v1 = vadd.f32 %v154_v0, %v59_v62  ;;  %v156_v2 = vpop.f32.mrb[1].mxu0 }
  0xfd   :  { %v157_v3 = vadd.f32 %v156_v2, %v63_v63  ;;  %v158_v4 = vpop.f32.mrb[2].mxu0 }
  0xfe   :  { %v161_v5 = vmax.f32 %v155_v1, 0.0  ;;  %v159_v6 = vpop.f32.mrb[3].mxu0 }
  0xff   :  { %v162_v7 = vmax.f32 %v157_v3, 0.0 }
 0x100   :  { %v163_v9 = vpack.c.bf16 %v161_v5, %v161_v5 }
 0x101   :  { %v164_v8 = vpack.c.bf16 %v162_v7, %v162_v7 }
 0x103   :  { %401 = vmatprep.mubr.bf16.mxu1 %v164_v8 }
 0x104   :  { %402 = vmatmul.mubr.bf16.vlgmr.msra.gmra.mrb[0].mxu1 %v163_v9 }
 0x1d7   :  { %v403_v17 = vpop.f32.mrb[0].mxu1 }
 0x1d8   :  { %v404_v18 = vadd.f32 %v403_v17, %v202_v15  ;;  %v405_v19 = vpop.f32.mrb[1].mxu1 }
 0x1d9   :  { %v406_v20 = vadd.f32 %v405_v19, %v206_v16  ;;  %v407_v21 = vpop.f32.mrb[2].mxu1 }
 0x1da   :  { %v410_v22 = vmax.f32 %v404_v18, 0.0  ;;  %v408_v23 = vpop.f32.mrb[3].mxu1 }
 0x1db   :  { %v411_v24 = vmax.f32 %v406_v20, 0.0 }
 0x1dc   :  { %v412_v26 = vpack.c.bf16 %v410_v22, %v410_v22 }
 0x1dd   :  { %v413_v25 = vpack.c.bf16 %v411_v24, %v411_v24 }
 0x1df   :  { %581 = vmatprep.mubr.bf16.mxu0 %v413_v25 }
 0x1e0   :  { %582 = vmatmul.mubr.bf16.vlgmr.msra.gmra.mrb[4].mxu0 %v412_v26 }
 0x2b3   :  { %v690_v27 = vpop.f32.mrb[4].mxu0 }
 0x2b4   :  { %v691_v29 = vpop.f32.mrb[5].mxu0 }
 0x2b5   :  { %v692_v30 = vadd.f32 %v691_v29, %v690_v27  ;;  %v693_v31 = vpop.f32.mrb[6].mxu0 }
 0x2b6   :  { %v694_v32 = vpop.f32.mrb[7].mxu0 }
 0x2b7   :  { %v584_v33 = vadd.f32 %v692_v30, %v657_v28 }
 0x2b9   :  { %v589_v34 = vsub.f32 0.0, %v584_v33 }
 0x2bb   :  { %v590_v35 = vmul.f32 1.442695, %v589_v34 }
 0x2bd   :  { %782 = vpow2.f32 %v590_v35 }
 0x2c7   :  { %v783_v36 = vpop.eup %782 }
 0x2c8   :  { %v592_v37 = vadd.f32 1.0, %v783_v36 }
 0x2ca   :  { %784 = vrcp.f32 %v592_v37 }
 0x2d4   :  { %v785_v38 = vpop.eup %784 }
 0x2d5   :  { %596 = vst.msk [vmem:[#allocation5] sm:$0xff] %vm595_vm1, %v785_v38 }
 0x2d6   :  { %601 = vsyncadd [#allocation4], 96  ;;  %s838_s4 = smov [#allocation5]  }
 0x2d7   :  { %s602_s21 = sshll.u32 %s838_s4, 4  ;;  %s603_s21 = int_to_ptr.vmem [resolvable:$true] %s602_s21 }
 0x2d8   :  { %s808_s3 = scalar_lea.vmem %s603_s21, 32  ;;  %s812_s6 = scalar_lea.vmem %s603_s21, 128 }
 0x2d9   :  { %p809_p8 = scmp.ne.s32.totalorder %s603_s21, %s808_s3  ;;  %p813_p9 = scmp.lt.s32.totalorder %s603_s21, %s603_s21 }
 0x2da   :  { %p814_p10 = scmp.lt.s32.totalorder %s812_s6, %s808_s3 }
 0x2dc   :  { %p815_p11 = por %p814_p10, %p813_p9 }
 0x2de   :  { %p816_p12 = pnand %p815_p11, %p809_p8 }
 0x2e0   :  { %819 = shalt.err (!%p816_p12)
}
 0x2e1   :  { %s820_s24 = scalar_lea.hbm %s1002_s7, 32 }
 0x2e2   :  { %p821_p13 = scmp.ne.s32.totalorder %s1002_s7, %s820_s24  ;;  %p824_p0 = scmp.lt.u32.totalorder %s820_s24, %s1002_s7 }
 0x2e4   :  { %p826_p1 = pnand %p824_p0, %p821_p13 }
 0x2e6   :  { %829 = shalt.err (!%p826_p1)
}
 0x2e7   :  { %s839_s29 = smov 32   ;;  %s840_s30 = smov 2  }
 0x2e8   :  { %608 = dma.vmem_to_hbm [thread:$0]  %s603_s21, 32, %s1002_s7, [#allocation4], %s839_s29, %s839_s29, %s840_s30  }
 0x2e9   :  { %832 = dma.done.wait [#allocation4], 128  }
 0x2ea   :  { %833 = vsyncadd [#allocation4], 4294967168 }
 0x2eb   :  { %612 = vsyncpa [#allocation3], 1 }
 0x2ec   :  { %613 = vsyncpa [#allocation4], 1 }

</bundles_post_ra>
